<compile_context>
chip_gen: v7x
topology: tpu7x:2x2x1
jax: 0.10.0
libtpu: 0.0.40
codegen_flags: <defaults>
</compile_context>

<pallas_src>
import functools

import jax
import jax.numpy as jnp
from jax.experimental import pallas as pl
from jax.experimental.pallas import tpu as pltpu


def _round_up(a: int, b: int) -> int:
    return (a + b - 1) // b * b


def _knn_k1_kernel(x_ref, y_ref, xa_ref, ya_ref, old_ref,
                   min_out_ref, idx_out_ref,
                   acc_ref, m_ref, a_ref, *,
                   cosine_dist: bool, n_valid_cols: int, bn: int):
    """Grid = (Bx tiles, By tiles, D chunks).  Accumulate x @ y^T over D,
    reduce over By into a running (min, argmin) carried in VMEM scratch."""
    j = pl.program_id(1)
    k = pl.program_id(2)
    nj = pl.num_programs(1)
    nk = pl.num_programs(2)

    # ---- D-chunk reduction: accumulate the cross dot product on the MXU ----
    @pl.when(k == 0)
    def _():
        acc_ref[...] = jnp.zeros_like(acc_ref)

    acc_ref[...] += jax.lax.dot_general(
        x_ref[...], y_ref[...],
        dimension_numbers=(((1,), (1,)), ((), ())),   # contract last dims; no y.T
        preferred_element_type=jnp.float32)

    # ---- By-tile reduction: merge this tile into the running (min, argmin) ----
    @pl.when(k == nk - 1)
    def _():
        acc = acc_ref[...]                                        # (bm, bn) f32
        if cosine_dist:
            # x / y were pre-normalized in the glue (torch: x.mm(y.t())); the
            # aux refs are zeros here, the adds are negligible VALU filler.
            dist = acc + xa_ref[...] + ya_ref[...]
        else:
            # squared euclidean distance; sqrt is applied once per row at the end.
            dist = jnp.maximum(xa_ref[...] + ya_ref[...] - 2.0 * acc, 0.0)

        col = jax.lax.broadcasted_iota(jnp.int32, dist.shape, 1) + j * bn
        dist = jnp.where(col < n_valid_cols, dist, jnp.inf)       # mask y padding

        tile_min = jnp.min(dist, axis=1, keepdims=True)           # (bm, 1)
        big = jnp.iinfo(jnp.int32).max
        tile_arg = jnp.min(jnp.where(dist == tile_min, col, big),
                           axis=1, keepdims=True)                 # first occurrence

        prev_m = jnp.where(j == 0, jnp.full_like(tile_min, jnp.inf), m_ref[...])
        prev_a = jnp.where(j == 0, jnp.zeros_like(tile_arg), a_ref[...])
        better = tile_min < prev_m        # strict <: ties keep the earlier column
        m_ref[...] = jnp.where(better, tile_min, prev_m)
        a_ref[...] = jnp.where(better, tile_arg, prev_a)

    # ---- finalize: write outputs only on the very last (By, D) step ----
    @pl.when(jnp.logical_and(j == nj - 1, k == nk - 1))
    def _():
        best = m_ref[...]
        if not cosine_dist:
            best = jnp.sqrt(best)          # sqrt once per row, after the min
        min_out_ref[...] = jnp.minimum(best, old_ref[...])
        idx_out_ref[...] = a_ref[...]


def _knn_k1_pallas(x2d, y2d, old_min_col, *, cosine_dist,
                   bm=256, bn=1024, dk=1024):
    """Per-row nearest neighbour of x against y, merged with old minima."""
    Bx, D = x2d.shape
    By = y2d.shape[0]
    assert y2d.shape[1] == D

    if cosine_dist:
        # Match the torch module exactly: normalize once, then a plain matmul.
        x2d = x2d / jnp.sqrt(jnp.sum(x2d * x2d, axis=1, keepdims=True))
        y2d = y2d / jnp.sqrt(jnp.sum(y2d * y2d, axis=1, keepdims=True))
        x_aux = jnp.zeros((Bx, 1), jnp.float32)
        y_aux = jnp.zeros((1, By), jnp.float32)
    else:
        x_aux = jnp.sum(x2d * x2d, axis=1, keepdims=True)          # (Bx, 1)
        y_aux = jnp.sum(y2d * y2d, axis=1)[None, :]                # (1, By)

    # Tile sizes: shrink to the (8/128-aligned) full extent for small inputs.
    bm = min(bm, _round_up(Bx, 8))
    bn = min(bn, _round_up(By, 8))
    dk = min(dk, _round_up(D, 128))
    Bx_p, By_p, D_p = _round_up(Bx, bm), _round_up(By, bn), _round_up(D, dk)

    xp = jnp.pad(x2d, ((0, Bx_p - Bx), (0, D_p - D)))
    yp = jnp.pad(y2d, ((0, By_p - By), (0, D_p - D)))
    xap = jnp.pad(x_aux, ((0, Bx_p - Bx), (0, 0)))
    yap = jnp.pad(y_aux, ((0, 0), (0, By_p - By)))
    oldp = jnp.pad(old_min_col, ((0, Bx_p - Bx), (0, 0)), constant_values=jnp.inf)

    grid = (Bx_p // bm, By_p // bn, D_p // dk)
    kern = functools.partial(_knn_k1_kernel, cosine_dist=cosine_dist,
                             n_valid_cols=By, bn=bn)

    min_out, idx_out = pl.pallas_call(
        kern,
        out_shape=(jax.ShapeDtypeStruct((Bx_p, 1), jnp.float32),
                   jax.ShapeDtypeStruct((Bx_p, 1), jnp.int32)),
        grid_spec=pltpu.PrefetchScalarGridSpec(
            num_scalar_prefetch=0,
            grid=grid,
            in_specs=[
                pl.BlockSpec((bm, dk), lambda i, j, k: (i, k)),   # x tile
                pl.BlockSpec((bn, dk), lambda i, j, k: (j, k)),   # y tile
                pl.BlockSpec((bm, 1), lambda i, j, k: (i, 0)),    # x aux (norms)
                pl.BlockSpec((1, bn), lambda i, j, k: (0, j)),    # y aux (norms)
                pl.BlockSpec((bm, 1), lambda i, j, k: (i, 0)),    # old min
            ],
            out_specs=(pl.BlockSpec((bm, 1), lambda i, j, k: (i, 0)),
                       pl.BlockSpec((bm, 1), lambda i, j, k: (i, 0))),
            scratch_shapes=[pltpu.VMEM((bm, bn), jnp.float32),    # dot accumulator
                            pltpu.VMEM((bm, 1), jnp.float32),     # running min
                            pltpu.VMEM((bm, 1), jnp.int32)],      # running argmin
        ),
        compiler_params=pltpu.CompilerParams(
            dimension_semantics=("parallel", "arbitrary", "arbitrary"),
            vmem_limit_bytes=32 * 1024 * 1024,
        ),
    )(xp, yp, xap, yap, oldp)

    return min_out[:Bx, 0], idx_out[:Bx, 0]


@functools.partial(jax.jit, static_argnames=("cosine_dist",),
                   donate_argnums=(0, 1))
def _knn_forward_k1(min_dists, nn_indices, x, y, x_idx_start, y_idx_start,
                    *, cosine_dist):
    x_bsize = x.shape[0]
    x2d = x.reshape(x_bsize, -1).astype(jnp.float32)
    y2d = y.reshape(y.shape[0], -1).astype(jnp.float32)

    old = jax.lax.dynamic_slice(min_dists, (x_idx_start,), (x_bsize,))
    new_min, nn_idx = _knn_k1_pallas(x2d, y2d, old[:, None],
                                     cosine_dist=cosine_dist)
    nn_idx = nn_idx + jnp.asarray(y_idx_start, jnp.int32)   # offset folded in glue

    min_dists = jax.lax.dynamic_update_slice(min_dists, new_min, (x_idx_start,))
    nn_indices = jax.lax.dynamic_update_slice(nn_indices, nn_idx, (x_idx_start,))
    return min_dists, nn_indices


class KNNComputer:
    """JAX/Pallas port of the PyTorch KNNComputer (K=1 path)."""

    def __init__(self, sample_num: int, k: int = 1, cosine_dist: bool = False):
        # TODO(synk): the K>1 path relies on torch.sort plus a data-dependent
        #             while-loop that skips duplicate zero distances; only
        #             K == 1 is implemented here.
        assert k == 1, "only K == 1 is supported by the Pallas port"
        self.K = k
        self.cosine_dist = cosine_dist
        self.num_computed = jnp.zeros([], jnp.float32)
        self.min_dists = jnp.full((sample_num,), jnp.inf, jnp.float32)
        # torch uses int64; int32 here (fine unless the reference set > 2^31).
        self.nn_indices = jnp.zeros((sample_num,), jnp.int32)

    def forward(self, x, x_idx_start, y, y_idx_start):
        self.min_dists, self.nn_indices = _knn_forward_k1(
            self.min_dists, self.nn_indices, x, y, x_idx_start, y_idx_start,
            cosine_dist=self.cosine_dist)

    def get_mean_nn_dist(self, sidx, eidx):
        if self.K == 1:
            return jnp.mean(self.min_dists[sidx:eidx])


if __name__ == "__main__":
    key = jax.random.PRNGKey(0)
    kx, ky1, ky2 = jax.random.split(key, 3)

    # small NCHW shapes consistent with the module (D = 4*16*16 = 1024)
    x = jax.random.normal(kx, (2, 4, 16, 16), jnp.float32)
    y1 = jax.random.normal(ky1, (3, 4, 16, 16), jnp.float32)
    y2 = jax.random.normal(ky2, (3, 4, 16, 16), jnp.float32)

    xf = x.reshape(2, -1)
    y1f = y1.reshape(3, -1)
    y2f = y2.reshape(3, -1)

    # ------------------ euclidean path, two banks (exercises the merge) -----
    knn = KNNComputer(sample_num=8, k=1, cosine_dist=False)
    x_idx_start = 2
    knn.forward(x, x_idx_start, y1, 0)
    knn.forward(x, x_idx_start, y2, 3)
    jax.block_until_ready((knn.min_dists, knn.nn_indices))

    def cdist(a, b):
        return jnp.sqrt(jnp.sum((a[:, None, :] - b[None, :, :]) ** 2, axis=-1))

    d1, d2 = cdist(xf, y1f), cdist(xf, y2f)
    ref_min = jnp.minimum(jnp.min(d1, axis=1), jnp.min(d2, axis=1))
    # torch semantics: nn_indices is always overwritten by the latest batch
    ref_idx = (jnp.argmin(d2, axis=1) + 3).astype(jnp.int32)

    assert jnp.allclose(knn.min_dists[x_idx_start:x_idx_start + 2], ref_min,
                        rtol=1e-4, atol=1e-4)
    assert jnp.array_equal(knn.nn_indices[x_idx_start:x_idx_start + 2], ref_idx)
    assert jnp.all(jnp.isinf(knn.min_dists[:x_idx_start]))   # untouched rows

    # ------------------ cosine path ------------------------------------------
    knn_c = KNNComputer(sample_num=8, k=1, cosine_dist=True)
    knn_c.forward(x, 0, y1, 5)
    jax.block_until_ready((knn_c.min_dists, knn_c.nn_indices))

    xn = xf / jnp.linalg.norm(xf, axis=1, keepdims=True)
    yn = y1f / jnp.linalg.norm(y1f, axis=1, keepdims=True)
    sim = xn @ yn.T
    ref_min_c = jnp.min(sim, axis=1)                       # min(..., inf) == min
    ref_idx_c = (jnp.argmin(sim, axis=1) + 5).astype(jnp.int32)

    assert jnp.allclose(knn_c.min_dists[0:2], ref_min_c, rtol=1e-5, atol=1e-5)
    assert jnp.array_equal(knn_c.nn_indices[0:2], ref_idx_c)

    print("KERNEL_OK")
</pallas_src>

<mosaic_0001>
module attributes {stable_mosaic.version = 11 : i64} {
  func.func @_knn_k1_kernel(%arg0: i32, %arg1: i32, %arg2: i32, %arg3: memref<8x1024xf32, #tpu.memory_space<vmem>>, %arg4: memref<8x1024xf32, #tpu.memory_space<vmem>>, %arg5: memref<8x1xf32, #tpu.memory_space<vmem>>, %arg6: memref<1x8xf32, #tpu.memory_space<vmem>>, %arg7: memref<8x1xf32, #tpu.memory_space<vmem>>, %arg8: memref<8x1xf32, #tpu.memory_space<vmem>>, %arg9: memref<8x1xi32, #tpu.memory_space<vmem>>, %arg10: memref<8x8xf32, #tpu.memory_space<vmem>>, %arg11: memref<8x1xf32, #tpu.memory_space<vmem>>, %arg12: memref<8x1xi32, #tpu.memory_space<vmem>>) attributes {dimension_semantics = [#tpu.dimension_semantics<parallel>, #tpu.dimension_semantics<arbitrary>, #tpu.dimension_semantics<arbitrary>], iteration_bounds = array<i64: 1, 1, 1>, scalar_prefetch = 0 : i64, scratch_operands = 3 : i64, tpu.core_type = #tpu.core_type<tc>, window_params = [{transform_indices = @transform_0, window_bounds = array<i64: 8, 1024>}, {transform_indices = @transform_1, window_bounds = array<i64: 8, 1024>}, {transform_indices = @transform_2, window_bounds = array<i64: 8, 1>}, {transform_indices = @transform_3, window_bounds = array<i64: 1, 8>}, {transform_indices = @transform_4, window_bounds = array<i64: 8, 1>}, {transform_indices = @transform_5, window_bounds = array<i64: 8, 1>}, {transform_indices = @transform_6, window_bounds = array<i64: 8, 1>}]} {
    %c0_i32 = arith.constant 0 : i32
    %0 = arith.cmpi eq, %arg2, %c0_i32 : i32
    %1 = arith.extui %0 : i1 to i32
    %c0_i32_0 = arith.constant 0 : i32
    %2 = arith.cmpi ne, %1, %c0_i32_0 : i32
    scf.if %2 {
      %cst_13 = arith.constant 0.000000e+00 : f32
      %17 = vector.broadcast %cst_13 : f32 to vector<8x8xf32>
      %c0_14 = arith.constant 0 : index
      %c0_15 = arith.constant 0 : index
      %18 = vector.load %arg10[%c0_14, %c0_15] : memref<8x8xf32, #tpu.memory_space<vmem>>, vector<8x8xf32>
      tpu.vector_store %arg10[%c0_14, %c0_15], %17 {strides = array<i32>} : memref<8x8xf32, #tpu.memory_space<vmem>>, vector<8x8xf32>,
    } else {
    }
    %c0 = arith.constant 0 : index
    %c0_1 = arith.constant 0 : index
    %3 = vector.load %arg10[%c0, %c0_1] : memref<8x8xf32, #tpu.memory_space<vmem>>, vector<8x8xf32>
    %c0_2 = arith.constant 0 : index
    %c0_3 = arith.constant 0 : index
    %4 = vector.load %arg3[%c0_2, %c0_3] : memref<8x1024xf32, #tpu.memory_space<vmem>>, vector<8x1024xf32>
    %c0_4 = arith.constant 0 : index
    %c0_5 = arith.constant 0 : index
    %5 = vector.load %arg4[%c0_4, %c0_5] : memref<8x1024xf32, #tpu.memory_space<vmem>>, vector<8x1024xf32>
    %cst = arith.constant dense<0.000000e+00> : vector<8x8xf32>
    %6 = tpu.matmul %4, %5, %cst {dimension_numbers = #tpu.dot_dimension_numbers<[1], [1], [0], [0], [0, 0, 1, 0], [], []>} : vector<8x1024xf32>, vector<8x1024xf32>, vector<8x8xf32> -> vector<8x8xf32>
    %7 = arith.addf %3, %6 : vector<8x8xf32>
    %c0_6 = arith.constant 0 : index
    %c0_7 = arith.constant 0 : index
    %8 = vector.load %arg10[%c0_6, %c0_7] : memref<8x8xf32, #tpu.memory_space<vmem>>, vector<8x8xf32>
    tpu.vector_store %arg10[%c0_6, %c0_7], %7 {strides = array<i32>} : memref<8x8xf32, #tpu.memory_space<vmem>>, vector<8x8xf32>,
    %c0_i32_8 = arith.constant 0 : i32
    %9 = arith.cmpi eq, %arg2, %c0_i32_8 : i32
    %10 = arith.extui %9 : i1 to i32
    %c0_i32_9 = arith.constant 0 : i32
    %11 = arith.cmpi ne, %10, %c0_i32_9 : i32
    scf.if %11 {
      %c0_13 = arith.constant 0 : index
      %c0_14 = arith.constant 0 : index
      %17 = vector.load %arg10[%c0_13, %c0_14] : memref<8x8xf32, #tpu.memory_space<vmem>>, vector<8x8xf32>
      %c0_15 = arith.constant 0 : index
      %c0_16 = arith.constant 0 : index
      %18 = vector.load %arg5[%c0_15, %c0_16] : memref<8x1xf32, #tpu.memory_space<vmem>>, vector<8x1xf32>
      %c0_17 = arith.constant 0 : index
      %c0_18 = arith.constant 0 : index
      %19 = vector.load %arg6[%c0_17, %c0_18] : memref<1x8xf32, #tpu.memory_space<vmem>>, vector<1x8xf32>
      %20 = vector.broadcast %18 : vector<8x1xf32> to vector<8x8xf32>
      %21 = vector.broadcast %19 : vector<1x8xf32> to vector<8x8xf32>
      %22 = arith.addf %20, %21 : vector<8x8xf32>
      %cst_19 = arith.constant 2.000000e+00 : f32
      %23 = vector.broadcast %cst_19 : f32 to vector<8x8xf32>
      %24 = arith.mulf %23, %17 : vector<8x8xf32>
      %25 = arith.subf %22, %24 : vector<8x8xf32>
      %cst_20 = arith.constant 0.000000e+00 : f32
      %26 = vector.broadcast %cst_20 : f32 to vector<8x8xf32>
      %27 = arith.maximumf %25, %26 : vector<8x8xf32>
      %28 = tpu.iota {dimensions = array<i32: 1>} : vector<8x8xi32>
      %c8_i32 = arith.constant 8 : i32
      %29 = arith.muli %arg1, %c8_i32 : i32
      %30 = vector.broadcast %29 : i32 to vector<8x8xi32>
      %31 = arith.addi %28, %30 : vector<8x8xi32>
      %c3_i32 = arith.constant 3 : i32
      %32 = vector.broadcast %c3_i32 : i32 to vector<8x8xi32>
      %33 = arith.cmpi slt, %31, %32 : vector<8x8xi32>
      %cst_21 = arith.constant 0x7F800000 : f32
      %34 = vector.broadcast %cst_21 : f32 to vector<8x8xf32>
      %35 = arith.select %33, %27, %34 : vector<8x8xi1>, vector<8x8xf32>
      %cst_22 = arith.constant dense<0x7F800000> : vector<8xf32>
      %36 = vector.multi_reduction <minimumf>, %35, %cst_22 [1] : vector<8x8xf32> to vector<8xf32>
      %37 = vector.shape_cast %36 : vector<8xf32> to vector<8x1xf32>
      %38 = vector.broadcast %37 : vector<8x1xf32> to vector<8x8xf32>
      %39 = arith.cmpf oeq, %35, %38 : vector<8x8xf32>
      %c2147483647_i32 = arith.constant 2147483647 : i32
      %40 = vector.broadcast %c2147483647_i32 : i32 to vector<8x8xi32>
      %41 = arith.select %39, %31, %40 : vector<8x8xi1>, vector<8x8xi32>
      %cst_23 = arith.constant dense<2147483647> : vector<8xi32>
      %42 = vector.multi_reduction <minsi>, %41, %cst_23 [1] : vector<8x8xi32> to vector<8xi32>
      %43 = vector.shape_cast %42 : vector<8xi32> to vector<8x1xi32>
      %c0_i32_24 = arith.constant 0 : i32
      %44 = arith.cmpi eq, %arg1, %c0_i32_24 : i32
      %cst_25 = arith.constant 0x7F800000 : f32
      %45 = vector.broadcast %cst_25 : f32 to vector<8x1xf32>
      %c0_26 = arith.constant 0 : index
      %c0_27 = arith.constant 0 : index
      %46 = vector.load %arg11[%c0_26, %c0_27] : memref<8x1xf32, #tpu.memory_space<vmem>>, vector<8x1xf32>
      %47 = arith.select %44, %45, %46 : vector<8x1xf32>
      %c0_i32_28 = arith.constant 0 : i32
      %48 = arith.cmpi eq, %arg1, %c0_i32_28 : i32
      %c0_i32_29 = arith.constant 0 : i32
      %49 = vector.broadcast %c0_i32_29 : i32 to vector<8x1xi32>
      %c0_30 = arith.constant 0 : index
      %c0_31 = arith.constant 0 : index
      %50 = vector.load %arg12[%c0_30, %c0_31] : memref<8x1xi32, #tpu.memory_space<vmem>>, vector<8x1xi32>
      %51 = arith.select %48, %49, %50 : vector<8x1xi32>
      %52 = arith.cmpf olt, %37, %47 : vector<8x1xf32>
      %53 = arith.select %52, %37, %47 : vector<8x1xi1>, vector<8x1xf32>
      %c0_32 = arith.constant 0 : index
      %c0_33 = arith.constant 0 : index
      %54 = vector.load %arg11[%c0_32, %c0_33] : memref<8x1xf32, #tpu.memory_space<vmem>>, vector<8x1xf32>
      tpu.vector_store %arg11[%c0_32, %c0_33], %53 {strides = array<i32>} : memref<8x1xf32, #tpu.memory_space<vmem>>, vector<8x1xf32>,
      %55 = arith.select %52, %43, %51 : vector<8x1xi1>, vector<8x1xi32>
      %c0_34 = arith.constant 0 : index
      %c0_35 = arith.constant 0 : index
      %56 = vector.load %arg12[%c0_34, %c0_35] : memref<8x1xi32, #tpu.memory_space<vmem>>, vector<8x1xi32>
      tpu.vector_store %arg12[%c0_34, %c0_35], %55 {strides = array<i32>} : memref<8x1xi32, #tpu.memory_space<vmem>>, vector<8x1xi32>,
    } else {
    }
    %c0_i32_10 = arith.constant 0 : i32
    %12 = arith.cmpi eq, %arg1, %c0_i32_10 : i32
    %c0_i32_11 = arith.constant 0 : i32
    %13 = arith.cmpi eq, %arg2, %c0_i32_11 : i32
    %14 = arith.andi %12, %13 : i1
    %15 = arith.extui %14 : i1 to i32
    %c0_i32_12 = arith.constant 0 : i32
    %16 = arith.cmpi ne, %15, %c0_i32_12 : i32
    scf.if %16 {
      %c0_13 = arith.constant 0 : index
      %c0_14 = arith.constant 0 : index
      %17 = vector.load %arg11[%c0_13, %c0_14] : memref<8x1xf32, #tpu.memory_space<vmem>>, vector<8x1xf32>
      %18 = math.sqrt %17 : vector<8x1xf32>
      %c0_15 = arith.constant 0 : index
      %c0_16 = arith.constant 0 : index
      %19 = vector.load %arg7[%c0_15, %c0_16] : memref<8x1xf32, #tpu.memory_space<vmem>>, vector<8x1xf32>
      %20 = arith.minimumf %18, %19 : vector<8x1xf32>
      %c0_17 = arith.constant 0 : index
      %c0_18 = arith.constant 0 : index
      %21 = vector.load %arg8[%c0_17, %c0_18] : memref<8x1xf32, #tpu.memory_space<vmem>>, vector<8x1xf32>
      tpu.vector_store %arg8[%c0_17, %c0_18], %20 {strides = array<i32>} : memref<8x1xf32, #tpu.memory_space<vmem>>, vector<8x1xf32>,
      %c0_19 = arith.constant 0 : index
      %c0_20 = arith.constant 0 : index
      %22 = vector.load %arg12[%c0_19, %c0_20] : memref<8x1xi32, #tpu.memory_space<vmem>>, vector<8x1xi32>
      %c0_21 = arith.constant 0 : index
      %c0_22 = arith.constant 0 : index
      %23 = vector.load %arg9[%c0_21, %c0_22] : memref<8x1xi32, #tpu.memory_space<vmem>>, vector<8x1xi32>
      tpu.vector_store %arg9[%c0_21, %c0_22], %22 {strides = array<i32>} : memref<8x1xi32, #tpu.memory_space<vmem>>, vector<8x1xi32>,
    } else {
    }
    return
  }
  func.func @transform_0(%arg0: i32, %arg1: i32, %arg2: i32) -> (i32, i32) {
    %c0_i32 = arith.constant 0 : i32
    return %arg0, %arg2 : i32, i32
  }
  func.func @transform_1(%arg0: i32, %arg1: i32, %arg2: i32) -> (i32, i32) {
    %c0_i32 = arith.constant 0 : i32
    return %arg1, %arg2 : i32, i32
  }
  func.func @transform_2(%arg0: i32, %arg1: i32, %arg2: i32) -> (i32, i32) {
    %c0_i32 = arith.constant 0 : i32
    %c0_i32_0 = arith.constant 0 : i32
    return %arg0, %c0_i32 : i32, i32
  }
  func.func @transform_3(%arg0: i32, %arg1: i32, %arg2: i32) -> (i32, i32) {
    %c0_i32 = arith.constant 0 : i32
    %c0_i32_0 = arith.constant 0 : i32
    return %c0_i32, %arg1 : i32, i32
  }
  func.func @transform_4(%arg0: i32, %arg1: i32, %arg2: i32) -> (i32, i32) {
    %c0_i32 = arith.constant 0 : i32
    %c0_i32_0 = arith.constant 0 : i32
    return %arg0, %c0_i32 : i32, i32
  }
  func.func @transform_5(%arg0: i32, %arg1: i32, %arg2: i32) -> (i32, i32) {
    %c0_i32 = arith.constant 0 : i32
    %c0_i32_0 = arith.constant 0 : i32
    return %arg0, %c0_i32 : i32, i32
  }
  func.func @transform_6(%arg0: i32, %arg1: i32, %arg2: i32) -> (i32, i32) {
    %c0_i32 = arith.constant 0 : i32
    %c0_i32_0 = arith.constant 0 : i32
    return %arg0, %c0_i32 : i32, i32
  }
}

</mosaic_0001>

<bundles_post_ra>
// kernel: _knn_forward_k1.1
= control target key start
LH: loop header
LB: loop body
LE: loop exit
PB: predicated region body
PF: predicated region fallthrough
CT: control target
= control target key end

     0   :  { %v423_v3 = vmov 0   ;;  %vm26_vm0 = vcmask 64512   ;;  %v424_v18 = vmov 0.0   ;;  %v349_v34 = vlaneseq  ;;  %s533_s1 = inlined_call_operand.vmem [shape: f32[8,1024], index: 1, kind: input, shape index: {}]   ;;  %s534_s0 = inlined_call_operand.vmem [shape: f32[8,1024], index: 0, kind: input, shape index: {}]   ;;  %s535_s2 = inlined_call_operand.vmem [shape: f32[8,1], index: 2, kind: input, shape index: {}]   ;;  %s536_s3 = inlined_call_operand.vmem [shape: f32[1,8], index: 3, kind: input, shape index: {}]   ;;  %s537_s4 = inlined_call_operand.vmem [shape: f32[8,1], index: 4, kind: input, shape index: {}]   ;;  %s538_s5 = inlined_call_operand.vmem [shape: f32[8,1], index: 5, kind: output, shape index: {0}]   ;;  %s539_s6 = inlined_call_operand.vmem [shape: s32[8,1], index: 6, kind: output, shape index: {1}]  }
   0x1   :  { %v38_v0 = vld [vmem:[%s533_s1 + $0x8] sm:$0xff]  ;;  %v37_v1 = vld [vmem:[%s533_s1] sm:$0xff]  ;;  %v40_v2 = vld [vmem:[%s533_s1 + $0x18] sm:$0xff]  ;;  %420 = vset.pattern.permute.xlu0 %v423_v3  ;;  %27 = vst.msk [vmem:[#allocation2] sm:$0xff] %vm26_vm0, %v424_v18  ;;  %vm386_vm2 = vcmask 7168  }
   0x2   :  { %45 = vmatprep.subr.mxu0 %v38_v0  ;;  %115 = vmatprep.subr.mxu1 %v40_v2  ;;  %v39_v4 = vld [vmem:[%s533_s1 + $0x10] sm:$0xff]  ;;  %v30_v5 = vld [vmem:[%s534_s0 + $0x8] sm:$0xff]  ;;  %v29_v6 = vld [vmem:[%s534_s0] sm:$0xff]  ;;  %v350_v37 = vand.u32 127, %v349_v34 }
   0x3   :  { %46 = vmatpush1.xpose.msra.mxu0 %v37_v1  ;;  %116 = vmatpush1.xpose.msra.mxu1 %v39_v4  ;;  %v32_v7 = vld [vmem:[%s534_s0 + $0x18] sm:$0xff]  ;;  %v42_v8 = vld [vmem:[%s533_s1 + $0x28] sm:$0xff]  ;;  %v31_v9 = vld [vmem:[%s534_s0 + $0x10] sm:$0xff] }
   0x4   :  { %109 = vmatprep.mubr.f32.mxu0 %v30_v5  ;;  %179 = vmatprep.mubr.f32.mxu1 %v32_v7  ;;  %v41_v10 = vld [vmem:[%s533_s1 + $0x20] sm:$0xff]  ;;  %v44_v11 = vld [vmem:[%s533_s1 + $0x38] sm:$0xff]  ;;  %v34_v12 = vld [vmem:[%s534_s0 + $0x28] sm:$0xff]  ;;  %vm354_vm1 = vcmp.lt.s32.totalorder %v350_v37, 3 }
   0x5   :  { %185 = vmatprep.subr.mxu0 %v42_v8  ;;  %255 = vmatprep.subr.mxu1 %v44_v11  ;;  %v43_v13 = vld [vmem:[%s533_s1 + $0x30] sm:$0xff]  ;;  %v36_v14 = vld [vmem:[%s534_s0 + $0x38] sm:$0xff]  ;;  %v332_v15 = vld [vmem:[%s535_s2] sm:$0xff] }
   0x6   :  { %110 = vmatmul.mubr.f32.vlgmr.msra.gmra.mrb[0].mxu0 %v29_v6  ;;  %180 = vmatmul.mubr.f32.vlgmr.msra.gmra.mrb[0].mxu1 %v31_v9  ;;  %v33_v16 = vld [vmem:[%s534_s0 + $0x20] sm:$0xff]  ;;  %v35_v17 = vld [vmem:[%s534_s0 + $0x30] sm:$0xff] }
   0x7   :  { %186 = vmatpush1.xpose.msra.mxu0 %v41_v10  ;;  %249 = vmatprep.mubr.f32.mxu0 %v34_v12  ;;  %v417_v32 = vld [vmem:[%s536_s3] ss:$0 sm:$0xff] }
   0x8   :  { %256 = vmatpush1.xpose.msra.mxu1 %v43_v13  ;;  %319 = vmatprep.mubr.f32.mxu1 %v36_v14  ;;  %v28_v28 = vld [vmem:[#allocation2] sm:$0xff] }
   0x9   :  { %336 = vperm.xlu0 %420, %v332_v15   ;;  %v403_v52 = vld [vmem:[%s537_s4] sm:$0xff] }
   0xa   :  { %250 = vmatmul.mubr.f32.vlgmr.msra.gmra.mrb[2].mxu0 %v33_v16 }
   0xb   :  { %320 = vmatmul.mubr.f32.vlgmr.msra.gmra.mrb[2].mxu1 %v35_v17 }
  0x88   :  { %v337_v33 = vpop.permute.xlu0 %336 }
  0x89   :  { %v345_v35 = vadd.f32 %v417_v32, %v337_v33 }
  0xd9   :  { %v111_v19 = vpop.f32.mrb[0].mxu0  ;;  %v181_v20 = vpop.f32.mrb[0].mxu1 }
  0xda   :  { %v113_v21 = vpop.f32.mrb[1].mxu0  ;;  %v182_v22 = vadd.f32 %v181_v20, %v111_v19  ;;  %v183_v23 = vpop.f32.mrb[1].mxu1 }
  0xdd   :  { %v251_v24 = vpop.f32.mrb[2].mxu0 }
  0xde   :  { %v252_v25 = vadd.f32 %v251_v24, %v182_v22  ;;  %v253_v26 = vpop.f32.mrb[3].mxu0  ;;  %v321_v27 = vpop.f32.mrb[2].mxu1 }
  0xdf   :  { %v323_v29 = vpop.f32.mrb[3].mxu1 }
  0xe0   :  { %v322_v30 = vadd.f32 %v321_v27, %v252_v25 }
  0xe2   :  { %v325_v31 = vadd.f32 %v322_v30, %v28_v28 }
  0xe4   :  { %327 = vst.msk [vmem:[#allocation2] sm:$0xff] %vm26_vm0, %v325_v31 }
  0xeb   :  { %v331_v36 = vld [vmem:[#allocation2] sm:$0xff] }
  0xec   :  { %v346_v38 = vmul.f32 2.0, %v331_v36 }
  0xee   :  { %v347_v39 = vsub.f32 %v345_v35, %v346_v38 }
  0xf0   :  { %v348_v40 = vmax.f32 %v347_v39, 0.0 }
  0xf2   :  { %v355_v41 = vsel %vm354_vm1, %v348_v40, inf }
  0xf3   :  { %v356_v42 = vsel %vm26_vm0, %v355_v41, inf }
  0xf4   :  { %357 = vmin.xlane.f32.xlu0 %v356_v42 }
 0x181   :  { %v358_v43 = vpop.xlane.xlu0 %357 }
 0x182   :  { %vm359_vm3 = vcmp.eq.f32.partialorder %v355_v41, %v358_v43  ;;  %vm384_vm4 = vcmp.lt.f32.partialorder %v358_v43, inf }
 0x183   :  { %v360_v44 = vsel %vm359_vm3, %v350_v37, 2147483647  ;;  %v385_v45 = vsel %vm384_vm4, %v358_v43, inf }
 0x184   :  { %387 = vst.msk [vmem:[#allocation3] sm:$0xff] %vm386_vm2, %v385_v45  ;;  %v361_v46 = vsel %vm26_vm0, %v360_v44, 2147483647 }
 0x185   :  { %v363_v47 = vshra.s32 %v361_v46, 16  ;;  %v362_v57 = vand.u32 65535, %v361_v46 }
 0x187   :  { %v365_v48 = vcvt.s32.f32 %v363_v47  ;;  %v364_v59 = vcvt.s32.f32 %v362_v57 }
 0x189   :  { %366 = vmin.xlane.f32.xlu1 %v365_v48 }
 0x18b   :  { %v395_v49 = vld [vmem:[#allocation3] sm:$0xff] }
 0x18c   :  { %421 = vrsqrt.f32 %v395_v49  ;;  %vm398_vm5 = vcmp.eq.f32.partialorder %v395_v49, inf  ;;  %v401_v53 = vand.u32 2147483648, %v395_v49  ;;  %vm400_vm6 = vcmp.eq.f32.partialorder %v395_v49, 0.0 }
 0x196   :  { %v422_v50 = vpop.eup %421 }
 0x197   :  { %v397_v51 = vmul.f32 %v422_v50, %v395_v49 }
 0x199   :  { %v399_v54 = vsel %vm398_vm5, %v395_v49, %v397_v51 }
 0x19a   :  { %v402_v55 = vsel %vm400_vm6, %v401_v53, %v399_v54 }
 0x19b   :  { %v404_v56 = vmin.f32 %v402_v55, %v403_v52 }
 0x19d   :  { %406 = vst.msk [vmem:[%s538_s5] sm:$0xff] %vm386_vm2, %v404_v56 }
 0x216   :  { %v367_v58 = vpop.xlane.xlu1 %366 }
 0x217   :  { %vm368_vm7 = vcmp.eq.f32.partialorder %v365_v48, %v367_v58  ;;  %v373_v61 = vcvt.f32.s32 %v367_v58 }
 0x218   :  { %v369_v60 = vsel %vm368_vm7, %v364_v59, inf }
 0x219   :  { %370 = vmin.xlane.f32.xlu1 %v369_v60  ;;  %v374_v63 = vshll.u32 %v373_v61, 16 }
 0x2a6   :  { %v371_v62 = vpop.xlane.xlu1 %370 }
 0x2a7   :  { %v372_v0 = vcvt.f32.s32 %v371_v62 }
 0x2a9   :  { %v375_v1 = vadd.s32 %v374_v63, %v372_v0 }
 0x2ab   :  { %v388_v2 = vsel %vm384_vm4, %v375_v1, 0 }
 0x2ac   :  { %389 = vst.msk [vmem:[#allocation4] sm:$0xff] %vm386_vm2, %v388_v2 }
 0x2b3   :  { %v407_v3 = vld [vmem:[#allocation4] sm:$0xff] }
 0x2b4   :  { %408 = vst.msk [vmem:[%s539_s6] sm:$0xff] %vm386_vm2, %v407_v3 }

</bundles_post_ra>
